<compile_context>
chip_gen: v5e
topology: v5e:2x2
jax: 0.10.0
libtpu: 0.0.40
codegen_flags: <defaults>
</compile_context>

<pallas_src>
import functools
import math

import jax
import jax.numpy as jnp
from jax.experimental import pallas as pl
from jax.experimental.pallas import tpu as pltpu


def _vmem_limit_bytes():
    """~75% of this generation's VMEM (v5e/v6e: 96 MiB, v7x: 48 MiB)."""
    try:
        cap = pltpu.get_tpu_info().vmem_capacity_bytes
        return int(cap) * 3 // 4
    except Exception:
        return 48 * 1024 * 1024


# ----------------------------- Pallas kernels ------------------------------


def _layernorm(x, g, b, eps=1e-5):
    mu = jnp.mean(x, axis=-1, keepdims=True)
    var = jnp.mean((x - mu) ** 2, axis=-1, keepdims=True)
    return (x - mu) * jax.lax.rsqrt(var + eps) * g + b


def encoder_layer_kernel(
    x_ref,
    wqkv_ref, bqkv_ref, wo_ref, bo_ref,
    g1_ref, b1_ref,
    w1_ref, bb1_ref, w2_ref, bb2_ref,
    g2_ref, b2_ref,
    o_ref,
    *, n_heads,
):
    x = x_ref[0]                                       # (S, D) f32
    S, D = x.shape
    dk = D // n_heads
    xb = x.astype(jnp.bfloat16)

    # ---- fused Q/K/V projection (bf16 MXU, f32 accumulate).
    # 1/sqrt(dk) is already folded into wq / bq at weight-prep time.
    qkv = jnp.dot(xb, wqkv_ref[...], preferred_element_type=jnp.float32) + bqkv_ref[...]
    q = qkv[:, :D].astype(jnp.bfloat16)                # cast BEFORE transposes
    k = qkv[:, D:2 * D].astype(jnp.bfloat16)
    v = qkv[:, 2 * D:].astype(jnp.bfloat16)

    # ---- packed all-heads attention via (h, S, dk) batched einsums ----
    qh = jnp.transpose(q.reshape(S, n_heads, dk), (1, 0, 2))
    kh = jnp.transpose(k.reshape(S, n_heads, dk), (1, 0, 2))
    vh = jnp.transpose(v.reshape(S, n_heads, dk), (1, 0, 2))

    s = jnp.einsum("hqd,hkd->hqk", qh, kh,
                   preferred_element_type=jnp.float32)            # (h,S,S) f32
    s = s - jnp.max(s, axis=-1, keepdims=True)
    p = jnp.exp(s)
    denom = jnp.sum(p, axis=-1, keepdims=True)                    # (h,S,1)

    ctx = jnp.einsum("hqk,hkd->hqd", p.astype(jnp.bfloat16), vh,
                     preferred_element_type=jnp.float32)          # (h,S,dk)
    # deferred softmax normalization: h*S*dk multiplies instead of h*S*S
    ctx = ctx * pl.reciprocal(denom, approx=True)

    att = jnp.transpose(ctx.astype(jnp.bfloat16), (1, 0, 2)).reshape(S, D)
    att = jnp.dot(att, wo_ref[...],
                  preferred_element_type=jnp.float32) + bo_ref[...]

    # ---- residual + layernorm 1 (f32) ----
    x1 = _layernorm(x + att, g1_ref[...], b1_ref[...])

    # ---- feed forward (bf16 matmuls, f32 elementwise) ----
    hdd = jnp.dot(x1.astype(jnp.bfloat16), w1_ref[...],
                  preferred_element_type=jnp.float32) + bb1_ref[...]
    hdd = jnp.maximum(hdd, 0.0)
    ff = jnp.dot(hdd.astype(jnp.bfloat16), w2_ref[...],
                 preferred_element_type=jnp.float32) + bb2_ref[...]

    # ---- residual + layernorm 2 (f32) ----
    o_ref[0] = _layernorm(x1 + ff, g2_ref[...], b2_ref[...])


def head_lse_kernel(x_ref, w_ref, b_ref, lse_ref, m_sc, l_sc):
    """Pass 1: stream vocab tiles, accumulate running max / sum-exp in VMEM."""
    j = pl.program_id(1)

    @pl.when(j == 0)
    def _():
        m_sc[...] = jnp.full(m_sc.shape, -jnp.inf, dtype=m_sc.dtype)
        l_sc[...] = jnp.zeros(l_sc.shape, dtype=l_sc.dtype)

    z = jnp.dot(x_ref[...], w_ref[...],
                preferred_element_type=jnp.float32) + b_ref[...]      # (tm, tv)
    m_prev = m_sc[...]                                                # (tm, 1)
    m_new = jnp.maximum(m_prev, jnp.max(z, axis=-1, keepdims=True))
    l_sc[...] = l_sc[...] * jnp.exp(m_prev - m_new) + jnp.sum(
        jnp.exp(z - m_new), axis=-1, keepdims=True)
    m_sc[...] = m_new

    @pl.when(j == pl.num_programs(1) - 1)
    def _():
        lse_ref[...] = m_sc[...] + jnp.log(l_sc[...])


def head_norm_kernel(x_ref, w_ref, b_ref, lse_ref, o_ref):
    """Pass 2: recompute the logits tile (bit-identical bf16 matmul) and
    write log_softmax = z - lse."""
    z = jnp.dot(x_ref[...], w_ref[...],
                preferred_element_type=jnp.float32) + b_ref[...]
    o_ref[...] = (z - lse_ref[...]).astype(o_ref.dtype)


# ----------------------------- wrappers -------------------------------------


def _resident_spec(shape):
    """Full-array block with constant index -> single-buffered resident weight."""
    nd = len(shape)
    return pl.BlockSpec(shape, lambda *_: (0,) * nd,
                        pipeline_mode=pl.Buffered(1))


def _pick_row_tile(m, want):
    """Largest multiple-of-8 divisor of m that is <= want (else m itself)."""
    if m <= want:
        return m
    t = (min(want, m) // 8) * 8
    while t >= 8:
        if m % t == 0:
            return t
        t -= 8
    return m


def encoder_layer_pallas(x, p, n_heads, *, vmem_limit):
    B, S, D = x.shape
    args = [
        p["wqkv"], p["bqkv"], p["wo"], p["bo"],
        p["g1"], p["b1"],
        p["w_ff1"], p["b_ff1"], p["w_ff2"], p["b_ff2"],
        p["g2"], p["b2"],
    ]
    # TODO(synk): at realistic BERT-base/large shapes on v7x (64 MiB/TC) split
    # attention / FFN into separate pallas_calls or add S-tile (flash-style
    # online softmax) and d_ff grid axes; all-resident is fine at these shapes.
    in_specs = [pl.BlockSpec((1, S, D), lambda b: (b, 0, 0))] + [
        _resident_spec(a.shape) for a in args
    ]
    return pl.pallas_call(
        functools.partial(encoder_layer_kernel, n_heads=n_heads),
        out_shape=jax.ShapeDtypeStruct((B, S, D), jnp.float32),
        grid=(B,),
        in_specs=in_specs,
        out_specs=pl.BlockSpec((1, S, D), lambda b: (b, 0, 0)),
        compiler_params=pltpu.CompilerParams(
            dimension_semantics=("parallel",),
            vmem_limit_bytes=vmem_limit),
    )(x, *args)


def lm_head_pallas(x, w_bf16, b, *, tv=512, out_dtype=jnp.float32, vmem_limit):
    """log_softmax(x @ w + b) with a streamed vocab axis and an online LSE."""
    B, S, D = x.shape
    V = w_bf16.shape[1]
    M = B * S
    assert tv % 128 == 0, tv

    # Flatten (B,S) -> M rows, cast activations to bf16 once (hoisted cast,
    # halves the activation DMA into both passes).
    xm = x.reshape(M, D).astype(jnp.bfloat16)

    # Row tiling: keep >=2 row tiles when possible (both v7x TCs busy) but a
    # small count so w_out is re-streamed at most a handful of times per pass.
    tm = _pick_row_tile(M, min(1024, max(8, M // 2)))
    nm = M // tm if M % tm == 0 else 1
    if M % tm != 0:
        tm = M

    # Vocab tiling + padding: padded columns get a -1e30 bias so exp() of
    # their logits underflows to 0 and never corrupts the log-sum-exp.
    V_pad = ((V + tv - 1) // tv) * tv
    nv = V_pad // tv
    if V_pad != V:
        w_p = jnp.pad(w_bf16, ((0, 0), (0, V_pad - V)))
        b_p = jnp.pad(b, ((0, 0), (0, V_pad - V)), constant_values=-1e30)
    else:
        w_p, b_p = w_bf16, b

    x_spec = pl.BlockSpec((tm, D), lambda i, j: (i, 0))
    w_spec = pl.BlockSpec((D, tv), lambda i, j: (0, j))
    b_spec = pl.BlockSpec((1, tv), lambda i, j: (0, j))
    lse_spec = pl.BlockSpec((tm, 1), lambda i, j: (i, 0))

    lse = pl.pallas_call(
        head_lse_kernel,
        out_shape=jax.ShapeDtypeStruct((M, 1), jnp.float32),
        grid=(nm, nv),
        in_specs=[x_spec, w_spec, b_spec],
        out_specs=lse_spec,
        scratch_shapes=[pltpu.VMEM((tm, 1), jnp.float32),
                        pltpu.VMEM((tm, 1), jnp.float32)],
        compiler_params=pltpu.CompilerParams(
            dimension_semantics=("parallel", "arbitrary"),
            vmem_limit_bytes=vmem_limit),
    )(xm, w_p, b_p)

    # TODO(synk): for decode-like small M (esp. v5e) store raw logits in pass 1
    # and make this pass a pure elementwise `out -= lse` via
    # input_output_aliases instead of recomputing the matmul.
    # TODO(synk): pass out_dtype=jnp.bfloat16 to halve the (M,V) HBM store if
    # downstream tolerates bf16 log-probs.
    out = pl.pallas_call(
        head_norm_kernel,
        out_shape=jax.ShapeDtypeStruct((M, V_pad), out_dtype),
        grid=(nm, nv),
        in_specs=[x_spec, w_spec, b_spec, lse_spec],
        out_specs=pl.BlockSpec((tm, tv), lambda i, j: (i, j)),
        compiler_params=pltpu.CompilerParams(
            dimension_semantics=("parallel", "parallel"),
            vmem_limit_bytes=vmem_limit),
    )(xm, w_p, b_p, lse)

    return out[:, :V].reshape(B, S, V)


def prepare_params(params, n_heads):
    """One-time weight prep: cast matmul weights to bf16, fuse Q/K/V into a
    single (D, 3D) weight and fold the 1/sqrt(dk) attention scale into wq/bq."""
    d_model = params["tok_emb"].shape[1]
    dk = d_model // n_heads
    scale = 1.0 / math.sqrt(dk)
    bf = lambda a: a.astype(jnp.bfloat16)

    prepared = {
        "tok_emb": params["tok_emb"],
        "pos_emb": params["pos_emb"],
        "w_out": bf(params["w_out"]),
        "b_out": params["b_out"].astype(jnp.float32),
        "layers": [],
    }
    for p in params["layers"]:
        wqkv = bf(jnp.concatenate([p["wq"] * scale, p["wk"], p["wv"]], axis=1))
        bqkv = jnp.concatenate([p["bq"] * scale, p["bk"], p["bv"]], axis=1
                               ).astype(jnp.float32)
        prepared["layers"].append({
            "wqkv": wqkv, "bqkv": bqkv,
            "wo": bf(p["wo"]), "bo": p["bo"],
            "g1": p["g1"], "b1": p["b1"],
            "w_ff1": bf(p["w_ff1"]), "b_ff1": p["b_ff1"],
            "w_ff2": bf(p["w_ff2"]), "b_ff2": p["b_ff2"],
            "g2": p["g2"], "b2": p["b2"],
        })
    return prepared


def token_prediction_head_forward(tokens, prepared_params, n_heads):
    vmem_limit = _vmem_limit_bytes()
    # TODO(synk): token-embedding gather stays in XLA glue (data-dependent row
    # gather; a Pallas version would need manual-DMA gather + scalar prefetch).
    emb = jnp.take(prepared_params["tok_emb"], tokens, axis=0) \
        + prepared_params["pos_emb"][None, :, :]
    x = emb.astype(jnp.float32)
    for layer_p in prepared_params["layers"]:
        x = encoder_layer_pallas(x, layer_p, n_heads, vmem_limit=vmem_limit)
    return lm_head_pallas(x, prepared_params["w_out"], prepared_params["b_out"],
                          vmem_limit=vmem_limit)


# --------------------------- pure-JAX reference ------------------------------


def _ref_forward(tokens, params, n_heads):
    x = jnp.take(params["tok_emb"], tokens, axis=0) + params["pos_emb"][None, :, :]
    B, S, D = x.shape
    dk = D // n_heads
    for p in params["layers"]:
        q = x @ p["wq"] + p["bq"]
        k = x @ p["wk"] + p["bk"]
        v = x @ p["wv"] + p["bv"]
        q = q.reshape(B, S, n_heads, dk).transpose(0, 2, 1, 3)
        k = k.reshape(B, S, n_heads, dk).transpose(0, 2, 1, 3)
        v = v.reshape(B, S, n_heads, dk).transpose(0, 2, 1, 3)
        s = jnp.einsum("bhqd,bhkd->bhqk", q, k) / math.sqrt(dk)
        a = jax.nn.softmax(s, axis=-1)
        att = jnp.einsum("bhqk,bhkd->bhqd", a, v).transpose(0, 2, 1, 3).reshape(B, S, D)
        att = att @ p["wo"] + p["bo"]
        x1 = x + att
        mu = x1.mean(-1, keepdims=True)
        var = ((x1 - mu) ** 2).mean(-1, keepdims=True)
        x1 = (x1 - mu) * jax.lax.rsqrt(var + 1e-5) * p["g1"] + p["b1"]
        ff = jnp.maximum(x1 @ p["w_ff1"] + p["b_ff1"], 0.0) @ p["w_ff2"] + p["b_ff2"]
        x2 = x1 + ff
        mu = x2.mean(-1, keepdims=True)
        var = ((x2 - mu) ** 2).mean(-1, keepdims=True)
        x = (x2 - mu) * jax.lax.rsqrt(var + 1e-5) * p["g2"] + p["b2"]
    logits = x @ params["w_out"] + params["b_out"]
    return jax.nn.log_softmax(logits, axis=2)


# --------------------------------- main --------------------------------------


def init_params(key, vocab_size, d_model, seq_len, n_layers, d_ff):
    keys = jax.random.split(key, 4 + n_layers)

    def lin(k, fan_in, fan_out):
        return 0.02 * jax.random.normal(k, (fan_in, fan_out), jnp.float32)

    params = {
        "tok_emb": 0.02 * jax.random.normal(keys[0], (vocab_size, d_model), jnp.float32),
        "pos_emb": 0.02 * jax.random.normal(keys[1], (seq_len, d_model), jnp.float32),
        "w_out": lin(keys[2], d_model, vocab_size),
        "b_out": jnp.zeros((1, vocab_size), jnp.float32),
        "layers": [],
    }
    for li in range(n_layers):
        ks = jax.random.split(keys[4 + li], 8)
        params["layers"].append({
            "wq": lin(ks[0], d_model, d_model), "bq": jnp.zeros((1, d_model), jnp.float32),
            "wk": lin(ks[1], d_model, d_model), "bk": jnp.zeros((1, d_model), jnp.float32),
            "wv": lin(ks[2], d_model, d_model), "bv": jnp.zeros((1, d_model), jnp.float32),
            "wo": lin(ks[3], d_model, d_model), "bo": jnp.zeros((1, d_model), jnp.float32),
            "g1": jnp.ones((1, d_model), jnp.float32), "b1": jnp.zeros((1, d_model), jnp.float32),
            "w_ff1": lin(ks[4], d_model, d_ff), "b_ff1": jnp.zeros((1, d_ff), jnp.float32),
            "w_ff2": lin(ks[5], d_ff, d_model), "b_ff2": jnp.zeros((1, d_model), jnp.float32),
            "g2": jnp.ones((1, d_model), jnp.float32), "b2": jnp.zeros((1, d_model), jnp.float32),
        })
    return params


if __name__ == "__main__":
    # Small module-consistent shapes.  vocab 1000 (not a tile multiple) so the
    # LM head exercises both the vocab padding path and a 2-step streamed LSE
    # (tv=512 -> V_pad=1024); B*S=16 exercises 2 parallel row tiles.
    vocab_size, d_model, seq_len, n_layers, h, d_ff = 1000, 32, 8, 2, 4, 64
    batch = 2

    key = jax.random.PRNGKey(0)
    k_tok, k_par = jax.random.split(key)
    tokens = jax.random.randint(k_tok, (batch, seq_len), 0, vocab_size, dtype=jnp.int32)
    params = init_params(k_par, vocab_size, d_model, seq_len, n_layers, d_ff)
    prep = prepare_params(params, h)   # one-time bf16 cast / QKV fusion / scale fold

    out = jax.block_until_ready(token_prediction_head_forward(tokens, prep, h))
    ref = jax.block_until_ready(_ref_forward(tokens, params, h))

    assert out.shape == (batch, seq_len, vocab_size)
    # bf16 matmuls + approx reciprocal -> looser tolerance than the pure-f32 ref
    assert jnp.allclose(out, ref, atol=2e-2, rtol=2e-2), float(jnp.max(jnp.abs(out - ref)))

    print("KERNEL_OK")
</pallas_src>

<mosaic_0001>
module attributes {stable_mosaic.version = 11 : i64} {
  func.func @encoder_layer_kernel(%arg0: i32, %arg1: memref<1x8x32xf32, #tpu.memory_space<vmem>>, %arg2: memref<32x96xbf16, #tpu.memory_space<vmem>>, %arg3: memref<1x96xf32, #tpu.memory_space<vmem>>, %arg4: memref<32x32xbf16, #tpu.memory_space<vmem>>, %arg5: memref<1x32xf32, #tpu.memory_space<vmem>>, %arg6: memref<1x32xf32, #tpu.memory_space<vmem>>, %arg7: memref<1x32xf32, #tpu.memory_space<vmem>>, %arg8: memref<32x64xbf16, #tpu.memory_space<vmem>>, %arg9: memref<1x64xf32, #tpu.memory_space<vmem>>, %arg10: memref<64x32xbf16, #tpu.memory_space<vmem>>, %arg11: memref<1x32xf32, #tpu.memory_space<vmem>>, %arg12: memref<1x32xf32, #tpu.memory_space<vmem>>, %arg13: memref<1x32xf32, #tpu.memory_space<vmem>>, %arg14: memref<1x8x32xf32, #tpu.memory_space<vmem>>) attributes {dimension_semantics = [#tpu.dimension_semantics<parallel>], iteration_bounds = array<i64: 2>, scalar_prefetch = 0 : i64, scratch_operands = 0 : i64, tpu.core_type = #tpu.core_type<tc>, window_params = [{transform_indices = @transform_0, window_bounds = array<i64: 1, 8, 32>}, {pipeline_mode = #tpu.pipeline_mode<synchronous>, transform_indices = @transform_1, window_bounds = array<i64: 32, 96>}, {pipeline_mode = #tpu.pipeline_mode<synchronous>, transform_indices = @transform_2, window_bounds = array<i64: 1, 96>}, {pipeline_mode = #tpu.pipeline_mode<synchronous>, transform_indices = @transform_3, window_bounds = array<i64: 32, 32>}, {pipeline_mode = #tpu.pipeline_mode<synchronous>, transform_indices = @transform_4, window_bounds = array<i64: 1, 32>}, {pipeline_mode = #tpu.pipeline_mode<synchronous>, transform_indices = @transform_5, window_bounds = array<i64: 1, 32>}, {pipeline_mode = #tpu.pipeline_mode<synchronous>, transform_indices = @transform_6, window_bounds = array<i64: 1, 32>}, {pipeline_mode = #tpu.pipeline_mode<synchronous>, transform_indices = @transform_7, window_bounds = array<i64: 32, 64>}, {pipeline_mode = #tpu.pipeline_mode<synchronous>, transform_indices = @transform_8, window_bounds = array<i64: 1, 64>}, {pipeline_mode = #tpu.pipeline_mode<synchronous>, transform_indices = @transform_9, window_bounds = array<i64: 64, 32>}, {pipeline_mode = #tpu.pipeline_mode<synchronous>, transform_indices = @transform_10, window_bounds = array<i64: 1, 32>}, {pipeline_mode = #tpu.pipeline_mode<synchronous>, transform_indices = @transform_11, window_bounds = array<i64: 1, 32>}, {pipeline_mode = #tpu.pipeline_mode<synchronous>, transform_indices = @transform_12, window_bounds = array<i64: 1, 32>}, {transform_indices = @transform_13, window_bounds = array<i64: 1, 8, 32>}]} {
    %c0 = arith.constant 0 : index
    %c0_0 = arith.constant 0 : index
    %c0_1 = arith.constant 0 : index
    %0 = vector.load %arg1[%c0, %c0_0, %c0_1] : memref<1x8x32xf32, #tpu.memory_space<vmem>>, vector<1x8x32xf32>
    %1 = vector.shape_cast %0 : vector<1x8x32xf32> to vector<8x32xf32>
    %2 = arith.truncf %1 : vector<8x32xf32> to vector<8x32xbf16>
    %c0_2 = arith.constant 0 : index
    %c0_3 = arith.constant 0 : index
    %3 = vector.load %arg2[%c0_2, %c0_3] : memref<32x96xbf16, #tpu.memory_space<vmem>>, vector<32x96xbf16>
    %cst = arith.constant dense<0.000000e+00> : vector<8x96xf32>
    %4 = tpu.matmul %2, %3, %cst {dimension_numbers = #tpu.dot_dimension_numbers<[1], [0], [0], [1], [0, 0, 1, 1], [], []>} : vector<8x32xbf16>, vector<32x96xbf16>, vector<8x96xf32> -> vector<8x96xf32>
    %c0_4 = arith.constant 0 : index
    %c0_5 = arith.constant 0 : index
    %5 = vector.load %arg3[%c0_4, %c0_5] : memref<1x96xf32, #tpu.memory_space<vmem>>, vector<1x96xf32>
    %6 = vector.broadcast %5 : vector<1x96xf32> to vector<8x96xf32>
    %7 = arith.addf %4, %6 : vector<8x96xf32>
    %8 = vector.extract_strided_slice %7 {offsets = [0, 0], sizes = [8, 32], strides = [1, 1]} : vector<8x96xf32> to vector<8x32xf32>
    %9 = arith.truncf %8 : vector<8x32xf32> to vector<8x32xbf16>
    %10 = vector.extract_strided_slice %7 {offsets = [0, 32], sizes = [8, 32], strides = [1, 1]} : vector<8x96xf32> to vector<8x32xf32>
    %11 = arith.truncf %10 : vector<8x32xf32> to vector<8x32xbf16>
    %12 = vector.extract_strided_slice %7 {offsets = [0, 64], sizes = [8, 32], strides = [1, 1]} : vector<8x96xf32> to vector<8x32xf32>
    %13 = arith.truncf %12 : vector<8x32xf32> to vector<8x32xbf16>
    %14 = vector.shape_cast %9 : vector<8x32xbf16> to vector<8x4x8xbf16>
    %15 = tpu.transpose %14, [1, 0, 2] : vector<8x4x8xbf16> -> vector<4x8x8xbf16>
    %16 = vector.shape_cast %11 : vector<8x32xbf16> to vector<8x4x8xbf16>
    %17 = tpu.transpose %16, [1, 0, 2] : vector<8x4x8xbf16> -> vector<4x8x8xbf16>
    %18 = vector.shape_cast %13 : vector<8x32xbf16> to vector<8x4x8xbf16>
    %19 = tpu.transpose %18, [1, 0, 2] : vector<8x4x8xbf16> -> vector<4x8x8xbf16>
    "tpu.trace_start"() <{level = 10 : i32, message = "hqd,hkd->hqk"}> : () -> ()
    %cst_6 = arith.constant dense<0.000000e+00> : vector<4x8x8xf32>
    %20 = tpu.matmul %15, %17, %cst_6 {dimension_numbers = #tpu.dot_dimension_numbers<[2], [2], [1], [1], [0, 0, 0, 1, 1, 1], [0], [0]>} : vector<4x8x8xbf16>, vector<4x8x8xbf16>, vector<4x8x8xf32> -> vector<4x8x8xf32>
    "tpu.trace_stop"() : () -> ()
    %cst_7 = arith.constant dense<0xFF800000> : vector<4x8xf32>
    %21 = vector.multi_reduction <maximumf>, %20, %cst_7 [2] : vector<4x8x8xf32> to vector<4x8xf32>
    %22 = vector.shape_cast %21 : vector<4x8xf32> to vector<4x8x1xf32>
    %23 = vector.broadcast %22 : vector<4x8x1xf32> to vector<4x8x8xf32>
    %24 = arith.subf %20, %23 : vector<4x8x8xf32>
    %25 = math.exp %24 : vector<4x8x8xf32>
    %cst_8 = arith.constant dense<0.000000e+00> : vector<4x8xf32>
    %26 = vector.multi_reduction <add>, %25, %cst_8 [2] : vector<4x8x8xf32> to vector<4x8xf32>
    %27 = vector.shape_cast %26 : vector<4x8xf32> to vector<4x8x1xf32>
    %28 = arith.truncf %25 : vector<4x8x8xf32> to vector<4x8x8xbf16>
    "tpu.trace_start"() <{level = 10 : i32, message = "hqk,hkd->hqd"}> : () -> ()
    %cst_9 = arith.constant dense<0.000000e+00> : vector<4x8x8xf32>
    %29 = tpu.matmul %28, %19, %cst_9 {dimension_numbers = #tpu.dot_dimension_numbers<[2], [1], [1], [2], [0, 0, 0, 1, 1, 2], [0], [0]>} : vector<4x8x8xbf16>, vector<4x8x8xbf16>, vector<4x8x8xf32> -> vector<4x8x8xf32>
    "tpu.trace_stop"() : () -> ()
    %30 = tpu.reciprocal %27 {approx = true} : vector<4x8x1xf32> -> vector<4x8x1xf32>
    %31 = vector.broadcast %30 : vector<4x8x1xf32> to vector<4x8x8xf32>
    %32 = arith.mulf %29, %31 : vector<4x8x8xf32>
    %33 = arith.truncf %32 : vector<4x8x8xf32> to vector<4x8x8xbf16>
    %34 = tpu.transpose %33, [1, 0, 2] : vector<4x8x8xbf16> -> vector<8x4x8xbf16>
    %35 = vector.shape_cast %34 : vector<8x4x8xbf16> to vector<8x32xbf16>
    %c0_10 = arith.constant 0 : index
    %c0_11 = arith.constant 0 : index
    %36 = vector.load %arg4[%c0_10, %c0_11] : memref<32x32xbf16, #tpu.memory_space<vmem>>, vector<32x32xbf16>
    %cst_12 = arith.constant dense<0.000000e+00> : vector<8x32xf32>
    %37 = tpu.matmul %35, %36, %cst_12 {dimension_numbers = #tpu.dot_dimension_numbers<[1], [0], [0], [1], [0, 0, 1, 1], [], []>} : vector<8x32xbf16>, vector<32x32xbf16>, vector<8x32xf32> -> vector<8x32xf32>
    %c0_13 = arith.constant 0 : index
    %c0_14 = arith.constant 0 : index
    %38 = vector.load %arg5[%c0_13, %c0_14] : memref<1x32xf32, #tpu.memory_space<vmem>>, vector<1x32xf32>
    %39 = vector.broadcast %38 : vector<1x32xf32> to vector<8x32xf32>
    %40 = arith.addf %37, %39 : vector<8x32xf32>
    %41 = arith.addf %1, %40 : vector<8x32xf32>
    %c0_15 = arith.constant 0 : index
    %c0_16 = arith.constant 0 : index
    %42 = vector.load %arg6[%c0_15, %c0_16] : memref<1x32xf32, #tpu.memory_space<vmem>>, vector<1x32xf32>
    %c0_17 = arith.constant 0 : index
    %c0_18 = arith.constant 0 : index
    %43 = vector.load %arg7[%c0_17, %c0_18] : memref<1x32xf32, #tpu.memory_space<vmem>>, vector<1x32xf32>
    %cst_19 = arith.constant dense<0.000000e+00> : vector<8xf32>
    %44 = vector.multi_reduction <add>, %41, %cst_19 [1] : vector<8x32xf32> to vector<8xf32>
    %45 = vector.shape_cast %44 : vector<8xf32> to vector<8x1xf32>
    %cst_20 = arith.constant 3.200000e+01 : f32
    %46 = vector.broadcast %cst_20 : f32 to vector<8x1xf32>
    %47 = arith.divf %45, %46 : vector<8x1xf32>
    %48 = vector.broadcast %47 : vector<8x1xf32> to vector<8x32xf32>
    %49 = arith.subf %41, %48 : vector<8x32xf32>
    %50 = arith.mulf %49, %49 : vector<8x32xf32>
    %cst_21 = arith.constant dense<0.000000e+00> : vector<8xf32>
    %51 = vector.multi_reduction <add>, %50, %cst_21 [1] : vector<8x32xf32> to vector<8xf32>
    %52 = vector.shape_cast %51 : vector<8xf32> to vector<8x1xf32>
    %cst_22 = arith.constant 3.200000e+01 : f32
    %53 = vector.broadcast %cst_22 : f32 to vector<8x1xf32>
    %54 = arith.divf %52, %53 : vector<8x1xf32>
    %55 = vector.broadcast %47 : vector<8x1xf32> to vector<8x32xf32>
    %56 = arith.subf %41, %55 : vector<8x32xf32>
    %cst_23 = arith.constant 9.99999974E-6 : f32
    %57 = vector.broadcast %cst_23 : f32 to vector<8x1xf32>
    %58 = arith.addf %54, %57 : vector<8x1xf32>
    %59 = math.rsqrt %58 : vector<8x1xf32>
    %60 = vector.broadcast %59 : vector<8x1xf32> to vector<8x32xf32>
    %61 = arith.mulf %56, %60 : vector<8x32xf32>
    %62 = vector.broadcast %42 : vector<1x32xf32> to vector<8x32xf32>
    %63 = arith.mulf %61, %62 : vector<8x32xf32>
    %64 = vector.broadcast %43 : vector<1x32xf32> to vector<8x32xf32>
    %65 = arith.addf %63, %64 : vector<8x32xf32>
    %66 = arith.truncf %65 : vector<8x32xf32> to vector<8x32xbf16>
    %c0_24 = arith.constant 0 : index
    %c0_25 = arith.constant 0 : index
    %67 = vector.load %arg8[%c0_24, %c0_25] : memref<32x64xbf16, #tpu.memory_space<vmem>>, vector<32x64xbf16>
    %cst_26 = arith.constant dense<0.000000e+00> : vector<8x64xf32>
    %68 = tpu.matmul %66, %67, %cst_26 {dimension_numbers = #tpu.dot_dimension_numbers<[1], [0], [0], [1], [0, 0, 1, 1], [], []>} : vector<8x32xbf16>, vector<32x64xbf16>, vector<8x64xf32> -> vector<8x64xf32>
    %c0_27 = arith.constant 0 : index
    %c0_28 = arith.constant 0 : index
    %69 = vector.load %arg9[%c0_27, %c0_28] : memref<1x64xf32, #tpu.memory_space<vmem>>, vector<1x64xf32>
    %70 = vector.broadcast %69 : vector<1x64xf32> to vector<8x64xf32>
    %71 = arith.addf %68, %70 : vector<8x64xf32>
    %cst_29 = arith.constant 0.000000e+00 : f32
    %72 = vector.broadcast %cst_29 : f32 to vector<8x64xf32>
    %73 = arith.maximumf %71, %72 : vector<8x64xf32>
    %74 = arith.truncf %73 : vector<8x64xf32> to vector<8x64xbf16>
    %c0_30 = arith.constant 0 : index
    %c0_31 = arith.constant 0 : index
    %75 = vector.load %arg10[%c0_30, %c0_31] : memref<64x32xbf16, #tpu.memory_space<vmem>>, vector<64x32xbf16>
    %cst_32 = arith.constant dense<0.000000e+00> : vector<8x32xf32>
    %76 = tpu.matmul %74, %75, %cst_32 {dimension_numbers = #tpu.dot_dimension_numbers<[1], [0], [0], [1], [0, 0, 1, 1], [], []>} : vector<8x64xbf16>, vector<64x32xbf16>, vector<8x32xf32> -> vector<8x32xf32>
    %c0_33 = arith.constant 0 : index
    %c0_34 = arith.constant 0 : index
    %77 = vector.load %arg11[%c0_33, %c0_34] : memref<1x32xf32, #tpu.memory_space<vmem>>, vector<1x32xf32>
    %78 = vector.broadcast %77 : vector<1x32xf32> to vector<8x32xf32>
    %79 = arith.addf %76, %78 : vector<8x32xf32>
    %80 = arith.addf %65, %79 : vector<8x32xf32>
    %c0_35 = arith.constant 0 : index
    %c0_36 = arith.constant 0 : index
    %81 = vector.load %arg12[%c0_35, %c0_36] : memref<1x32xf32, #tpu.memory_space<vmem>>, vector<1x32xf32>
    %c0_37 = arith.constant 0 : index
    %c0_38 = arith.constant 0 : index
    %82 = vector.load %arg13[%c0_37, %c0_38] : memref<1x32xf32, #tpu.memory_space<vmem>>, vector<1x32xf32>
    %cst_39 = arith.constant dense<0.000000e+00> : vector<8xf32>
    %83 = vector.multi_reduction <add>, %80, %cst_39 [1] : vector<8x32xf32> to vector<8xf32>
    %84 = vector.shape_cast %83 : vector<8xf32> to vector<8x1xf32>
    %cst_40 = arith.constant 3.200000e+01 : f32
    %85 = vector.broadcast %cst_40 : f32 to vector<8x1xf32>
    %86 = arith.divf %84, %85 : vector<8x1xf32>
    %87 = vector.broadcast %86 : vector<8x1xf32> to vector<8x32xf32>
    %88 = arith.subf %80, %87 : vector<8x32xf32>
    %89 = arith.mulf %88, %88 : vector<8x32xf32>
    %cst_41 = arith.constant dense<0.000000e+00> : vector<8xf32>
    %90 = vector.multi_reduction <add>, %89, %cst_41 [1] : vector<8x32xf32> to vector<8xf32>
    %91 = vector.shape_cast %90 : vector<8xf32> to vector<8x1xf32>
    %cst_42 = arith.constant 3.200000e+01 : f32
    %92 = vector.broadcast %cst_42 : f32 to vector<8x1xf32>
    %93 = arith.divf %91, %92 : vector<8x1xf32>
    %94 = vector.broadcast %86 : vector<8x1xf32> to vector<8x32xf32>
    %95 = arith.subf %80, %94 : vector<8x32xf32>
    %cst_43 = arith.constant 9.99999974E-6 : f32
    %96 = vector.broadcast %cst_43 : f32 to vector<8x1xf32>
    %97 = arith.addf %93, %96 : vector<8x1xf32>
    %98 = math.rsqrt %97 : vector<8x1xf32>
    %99 = vector.broadcast %98 : vector<8x1xf32> to vector<8x32xf32>
    %100 = arith.mulf %95, %99 : vector<8x32xf32>
    %101 = vector.broadcast %81 : vector<1x32xf32> to vector<8x32xf32>
    %102 = arith.mulf %100, %101 : vector<8x32xf32>
    %103 = vector.broadcast %82 : vector<1x32xf32> to vector<8x32xf32>
    %104 = arith.addf %102, %103 : vector<8x32xf32>
    %c0_44 = arith.constant 0 : index
    %c0_45 = arith.constant 0 : index
    %c0_46 = arith.constant 0 : index
    %105 = vector.load %arg14[%c0_44, %c0_45, %c0_46] : memref<1x8x32xf32, #tpu.memory_space<vmem>>, vector<1x8x32xf32>
    %106 = vector.shape_cast %105 : vector<1x8x32xf32> to vector<8x32xf32>
    %107 = vector.shape_cast %104 : vector<8x32xf32> to vector<1x8x32xf32>
    tpu.vector_store %arg14[%c0_44, %c0_45, %c0_46], %107 {strides = array<i32>} : memref<1x8x32xf32, #tpu.memory_space<vmem>>, vector<1x8x32xf32>,
    return
  }
  func.func @transform_0(%arg0: i32) -> (i32, i32, i32) {
    %c0_i32 = arith.constant 0 : i32
    %c0_i32_0 = arith.constant 0 : i32
    %c0_i32_1 = arith.constant 0 : i32
    return %arg0, %c0_i32, %c0_i32_0 : i32, i32, i32
  }
  func.func @transform_1(%arg0: i32) -> (i32, i32) {
    %c0_i32 = arith.constant 0 : i32
    %c0_i32_0 = arith.constant 0 : i32
    %c0_i32_1 = arith.constant 0 : i32
    return %c0_i32, %c0_i32_0 : i32, i32
  }
  func.func @transform_2(%arg0: i32) -> (i32, i32) {
    %c0_i32 = arith.constant 0 : i32
    %c0_i32_0 = arith.constant 0 : i32
    %c0_i32_1 = arith.constant 0 : i32
    return %c0_i32, %c0_i32_0 : i32, i32
  }
  func.func @transform_3(%arg0: i32) -> (i32, i32) {
    %c0_i32 = arith.constant 0 : i32
    %c0_i32_0 = arith.constant 0 : i32
    %c0_i32_1 = arith.constant 0 : i32
    return %c0_i32, %c0_i32_0 : i32, i32
  }
  func.func @transform_4(%arg0: i32) -> (i32, i32) {
    %c0_i32 = arith.constant 0 : i32
    %c0_i32_0 = arith.constant 0 : i32
    %c0_i32_1 = arith.constant 0 : i32
    return %c0_i32, %c0_i32_0 : i32, i32
  }
  func.func @transform_5(%arg0: i32) -> (i32, i32) {
    %c0_i32 = arith.constant 0 : i32
    %c0_i32_0 = arith.constant 0 : i32
    %c0_i32_1 = arith.constant 0 : i32
    return %c0_i32, %c0_i32_0 : i32, i32
  }
  func.func @transform_6(%arg0: i32) -> (i32, i32) {
    %c0_i32 = arith.constant 0 : i32
    %c0_i32_0 = arith.constant 0 : i32
    %c0_i32_1 = arith.constant 0 : i32
    return %c0_i32, %c0_i32_0 : i32, i32
  }
  func.func @transform_7(%arg0: i32) -> (i32, i32) {
    %c0_i32 = arith.constant 0 : i32
    %c0_i32_0 = arith.constant 0 : i32
    %c0_i32_1 = arith.constant 0 : i32
    return %c0_i32, %c0_i32_0 : i32, i32
  }
  func.func @transform_8(%arg0: i32) -> (i32, i32) {
    %c0_i32 = arith.constant 0 : i32
    %c0_i32_0 = arith.constant 0 : i32
    %c0_i32_1 = arith.constant 0 : i32
    return %c0_i32, %c0_i32_0 : i32, i32
  }
  func.func @transform_9(%arg0: i32) -> (i32, i32) {
    %c0_i32 = arith.constant 0 : i32
    %c0_i32_0 = arith.constant 0 : i32
    %c0_i32_1 = arith.constant 0 : i32
    return %c0_i32, %c0_i32_0 : i32, i32
  }
  func.func @transform_10(%arg0: i32) -> (i32, i32) {
    %c0_i32 = arith.constant 0 : i32
    %c0_i32_0 = arith.constant 0 : i32
    %c0_i32_1 = arith.constant 0 : i32
    return %c0_i32, %c0_i32_0 : i32, i32
  }
  func.func @transform_11(%arg0: i32) -> (i32, i32) {
    %c0_i32 = arith.constant 0 : i32
    %c0_i32_0 = arith.constant 0 : i32
    %c0_i32_1 = arith.constant 0 : i32
    return %c0_i32, %c0_i32_0 : i32, i32
  }
  func.func @transform_12(%arg0: i32) -> (i32, i32) {
    %c0_i32 = arith.constant 0 : i32
    %c0_i32_0 = arith.constant 0 : i32
    %c0_i32_1 = arith.constant 0 : i32
    return %c0_i32, %c0_i32_0 : i32, i32
  }
  func.func @transform_13(%arg0: i32) -> (i32, i32, i32) {
    %c0_i32 = arith.constant 0 : i32
    %c0_i32_0 = arith.constant 0 : i32
    %c0_i32_1 = arith.constant 0 : i32
    return %arg0, %c0_i32, %c0_i32_0 : i32, i32, i32
  }
}

</mosaic_0001>

<bundles_post_ra>
// kernel: tpu_custom_call.1
= control target key start
LH: loop header
LB: loop body
LE: loop exit
PB: predicated region body
PF: predicated region fallthrough
CT: control target
= control target key end

     0   :  { %s2177_s0 = inlined_call_operand.vmem [shape: f32[2,8,32], index: 0, kind: input, shape index: {}]   ;;  %s2178_s1 = inlined_call_operand.vmem [shape: bf16[32,96], index: 1, kind: input, shape index: {}]   ;;  %s2179_s2 = inlined_call_operand.vmem [shape: f32[1,96], index: 2, kind: input, shape index: {}]   ;;  %s2180_s3 = inlined_call_operand.vmem [shape: bf16[32,32], index: 3, kind: input, shape index: {}]   ;;  %s2181_s4 = inlined_call_operand.vmem [shape: f32[1,32], index: 4, kind: input, shape index: {}]   ;;  %s2182_s5 = inlined_call_operand.vmem [shape: f32[1,32], index: 5, kind: input, shape index: {}]   ;;  %s2183_s6 = inlined_call_operand.vmem [shape: f32[1,32], index: 6, kind: input, shape index: {}]   ;;  %s2184_s7 = inlined_call_operand.hbm [shape: bf16[32,64], index: 7, kind: input, shape index: {}]   ;;  %s2185_s8 = inlined_call_operand.vmem [shape: f32[1,64], index: 8, kind: input, shape index: {}]   ;;  %s2186_s9 = inlined_call_operand.vmem [shape: bf16[64,32], index: 9, kind: input, shape index: {}]   ;;  %s2187_s10 = inlined_call_operand.vmem [shape: f32[1,32], index: 10, kind: input, shape index: {}]   ;;  %s2188_s11 = inlined_call_operand.vmem [shape: f32[1,32], index: 11, kind: input, shape index: {}]   ;;  %s2189_s12 = inlined_call_operand.vmem [shape: f32[1,32], index: 12, kind: input, shape index: {}]   ;;  %s2190_s13 = inlined_call_operand.hbm [shape: f32[2,8,32], index: 13, kind: output, shape index: {}]  }
   0x1   :  { %2192 = sst [smem:[#allocation10_spill]] %s2177_s0 }
   0x2   :  { %2193 = sst [smem:[#allocation11_spill]] %s2184_s7 }
   0x3   :  { %18 = vsyncpa [#allocation3], 0 }
   0x4   :  { %19 = vsyncpa [#allocation4], 0 }
   0x5   :  { %21 = vsyncpa [#allocation4 + $0x1], 0  ;;  %s1838_s25 = smov 0   ;;  %s1840_s26 = smov 0  }
   0x6   :  { %s1842_s27 = smov 0   ;;  %s1844_s28 = smov 0  }
   0x7 LB: > { %2194 = sst [smem:[#allocation8_spill]] %s1748_s27  ;;  %s1859_s29 = sadd.s32 4294967295, %s1752_s28   ;;  %s1752_s28 = sphi %s1844_s28, %s2204_s28   ;;  %s1748_s27 = sphi %s1842_s27, %s2201_s27   ;;  %s1744_s26 = sphi %s1840_s26, %s2203_s26   ;;  %s1740_s25 = sphi %s1838_s25, %s2202_s25  }
   0x8   : > { %s1489_s30 = sadd.s32 4294967294, %s1752_s28   ;;  %s1863_s14 = sadd.s32 1, %s1752_s28  }
   0x9   : > { %s312_s15 = sadd.s32 1, %s1748_s27  ;;  %s309_s16 = ssub.s32 %s1752_s28, %s1863_s14 }
   0xa   : > { %p322_p0 = scmp.ne.s32.totalorder %s1748_s27, %s1744_s26  ;;  %p310_p1 = scmp.eq.s32.totalorder %s309_s16, 0 }
   0xb   : > { %p323_p2 = scmp.eq.s32.totalorder %s1859_s29, 1  ;;  %p328_p3 = scmp.ne.s32.totalorder %s1744_s26, %s1740_s25 }
   0xc   : > { %p329_p4 = scmp.eq.s32.totalorder %s1489_s30, 1  ;;  %p1490_p7 = scmp.ge.s32.totalorder %s1752_s28, 1 }
   0xd   : > { %s1874_s17 = scalar_select %p310_p1, %s1748_s27, %s312_s15  }
   0xe   : > { %p1876_p5 = por %p323_p2, %p322_p0  ;;  %p1880_p6 = por %p329_p4, %p328_p3 }
   0xf   : > { %2195 = sst [smem:[#allocation9_spill]] %s1874_s17  ;;  %p336_p8 = scmp.lt.s32.totalorder %s1752_s28, 3 }
  0x10   : > { %p1577_p9 = scmp.eq.s32.totalorder %s1859_s29, 0  ;;  %s2198_s7 = sld [smem:[#allocation11_spill]] }
  0x11   : > { %p337_p10 = pnand %p1490_p7, %p336_p8  ;;  %s1754_s23 = smov [#allocation2]  }
  0x12   : > { %s367_s24 = sshll.u32 %s1754_s23, 4  ;;  %s1755_s30 = smov 64   ;;  %s368_s24 = int_to_ptr.vmem [resolvable:$true] %s367_s24 }
  0x13   : > { %p1569_p11 = pneg %p337_p10  ;;  %s1756_s15 = smov 4  }
  0x14   : > { %405 = sbr.rel (%p337_p10) target bundleno = 1925 (0x785), region = 72 }
  0x15   : > { %p1570_p12 = pnand %p1577_p9, %p1569_p11 }
  0x16   : > { %s365_s22 = sshll.u32 %s2198_s7, 4  ;;  %s366_s22 = int_to_ptr.hbm [resolvable:$true] %s365_s22 }
  0x17   : > { %1572 = dma.hbm_to_vmem [thread:$0]  (!%p1570_p12), %s366_s22, 256, %s368_s24, [#allocation3], %s1755_s30, %s1755_s30, %s1756_s15  }
  0x19   : > { %1731 = dma.done.wait (%p1577_p9), [#allocation3], 256  }
  0x1a   : > { %1733 = vsyncadd (%p1577_p9), [#allocation3], 4294967040  ;;  %p449_p13 = scmp.lt.s32.totalorder %s1859_s29, 1  ;;  %s2199_s0 = sld [smem:[#allocation10_spill]]  ;;  %v1554_v0 = vld [vmem:[%s2178_s1 + $0x8] sm:$0xff]  ;;  %v1553_v1 = vld [vmem:[%s2178_s1] sm:$0xff] }
  0x1b   : > { %486 = vmatpush.bf16.msra.mxu0 %v1554_v0  ;;  %vm476_vm0 = vcmask 261120   ;;  %v1626_v4 = vld [vmem:[%s2179_s2] ss:$0 sm:$0xff]  ;;  %s1757_s27 = smov 104   ;;  %s1758_s17 = smov 120   ;;  %vm524_vm1 = vcmask 1047556  }
  0x1c   : > { %s450_s16 = scalar_select %p449_p13, %s1859_s29, 1  ;;  %v1762_v9 = vmov 1983009808   ;;  %v1763_v18 = vmov 1934713408   ;;  %vm860_vm2 = vcmask 64512  }
  0x1d   : > { %v515_v10 = vunpack.c.l.s4 %v1762_v9  ;;  %v529_v19 = vunpack.c.l.s4 %v1763_v18  ;;  %vm980_vm3 = vcmask 1043456   ;;  %s1764_s21 = smov 8   ;;  %s1765_s23 = smov 16   ;;  %vm1195_vm4 = vcmask 130048  }
  0x1e   : > { %s1496_s20 = sshll.u32 %s450_s16, 3  ;;  %s1760_s16 = smov 112   ;;  %vm1198_vm5 = vcmask 195584   ;;  %vm1351_vm10 = vcmask 523264  }
  0x1f   : > { %487 = vmatpush.bf16.msra.mxu0 %v1553_v1  ;;  %v1917_v14 = vunpack.c.0.s8 %v515_v10  ;;  %v1922_v26 = vunpack.c.0.s8 %v529_v19  ;;  %s1766_s22 = smov 24   ;;  %s446_s24 = sand.u32 1, %s1744_s26  }
  0x20   : > { %s452_s7 = scalar_lea.vmem %s2199_s0, %s1496_s20  ;;  %s1761_s20 = smov 64  }
  0x21   : > { %v1907_v2 = vld [vmem:[%s452_s7] sm:$0xff]  ;;  %s1759_s7 = smov 96   ;;  %s1495_s30 = sshll.u32 %s446_s24, 3 }
  0x22   : > { %v455_v3 = vpack.c.bf16 %v1907_v2, %v1907_v2  ;;  %s1550_s15 = sshll.u32 %s1859_s29, 3 }
  0x24   : > { %1505 = vmatmul.msk.bf16.vlgmr.msra.gmra.mxu0 %vm476_vm0, %v455_v3 }
  0xa1   : > { %v489_v5 = vpop.f32.mrf.mxu0 }
  0xa2   : > { %v490_v6 = vadd.f32 %v1626_v4, %v489_v5 }
  0xa4   : > { %v493_v7 = vpack.c.bf16 %v490_v6, %v490_v6 }
  0xa6   : > { %499 = vrot.lane.b32.xlu1 %v493_v7, %s1757_s27  ;;  %495 = vrot.lane.b32.xlu0 %v493_v7, %s1758_s17  ;;  %v504_v16 = vshrl.u32 %v493_v7, 16  ;;  %s1403_s27 = scalar_lea.sflag [#allocation4], %s446_s24 }
  0xa9   : > { %v491_v8 = vpop.f32.mrf.mxu0 }
  0xae   : > { %616 = vrot.lane.b32.xlu1 %v493_v7, %s1759_s7  ;;  %497 = vrot.lane.b32.xlu0 %v493_v7, %s1760_s16 }
  0xb6   : > { %738 = vrot.lane.b32.xlu1 %v493_v7, %s1761_s20 }
 0x118   : > { %v500_v11 = vpop.permute.xlu1 %499  ;;  %v496_v12 = vpop.permute.xlu0 %495 }
 0x119   : > { %v505_v13 = vshrl.u32 %v496_v12, 16  ;;  %744 = vrot.lane.b32.xlu1 %v500_v11, %s1761_s20  ;;  %622 = vrot.lane.b32.xlu0 %v500_v11, %s1759_s7  ;;  %v503_v15 = vpack.i.b16 %v496_v12, %v493_v7  ;;  %v511_v22 = vshrl.u32 %v500_v11, 16 }
 0x11a   : > { %618 = vrot.lane.b32.xlu2 %v496_v12, %s1759_s7 }
 0x11b   : > { %v506_v17 = vpack.i.b16 %v505_v13, %v504_v16  ;;  %v517_v20 = vperm.slane %v503_v15, %v1917_v14 }
 0x11d   : > { %v544_v23 = vperm.slane %v506_v17, %v1917_v14  ;;  %v526_v27 = vrot.slane %v517_v20, 4 }
 0x11f   : > { %v552_v30 = vrot.slane %v544_v23, 4 }
 0x120   : > { %v498_v21 = vpop.permute.xlu0 %497  ;;  %v617_v18 = vpop.permute.xlu1 %616 }
 0x121   : > { %v509_v24 = vpack.i.b16 %v500_v11, %v498_v21  ;;  %v510_v25 = vshrl.u32 %v498_v21, 16  ;;  %742 = vrot.lane.b32.xlu0 %v498_v21, %s1761_s20 }
 0x122   : > { %620 = vrot.lane.b32.xlu2 %v498_v21, %s1759_s7 }
 0x123   : > { %v512_v28 = vpack.i.b16 %v511_v22, %v510_v25  ;;  %v522_v29 = vperm.slane %v509_v24, %v1917_v14 }
 0x125   : > { %v523_v31 = vrot.slane %v522_v29, 4  ;;  %v527_v32 = vsel %vm524_vm1, %v522_v29, %v526_v27  ;;  %v549_v33 = vperm.slane %v512_v28, %v1917_v14 }
 0x126   : > { %v535_v34 = vperm.slane %v527_v32, %v1922_v26 }
 0x127   : > { %v525_v35 = vsel %vm524_vm1, %v523_v31, %v517_v20  ;;  %v550_v36 = vrot.slane %v549_v33, 4  ;;  %v553_v37 = vsel %vm524_vm1, %v549_v33, %v552_v30  ;;  %v627_v20 = vshrl.u32 %v617_v18, 16 }
 0x128   : > { %v531_v38 = vperm.slane %v525_v35, %v1922_v26  ;;  %v538_v39 = vrot.slane %v535_v34, 4  ;;  %v561_v40 = vperm.slane %v553_v37, %v1922_v26  ;;  %v739_v24 = vpop.permute.xlu1 %738 }
 0x129   : > { %v551_v41 = vsel %vm524_vm1, %v550_v36, %v544_v23  ;;  %v749_v33 = vshrl.u32 %v739_v24, 16 }
 0x12a   : > { %v536_v42 = vrot.slane %v531_v38, 4  ;;  %v539_v43 = vsel %vm524_vm1, 0, %v538_v39  ;;  %v557_v44 = vperm.slane %v551_v41, %v1922_v26  ;;  %v564_v45 = vrot.slane %v561_v40, 4  ;;  %740 = vrot.lane.b32.xlu2 %v496_v12, %s1761_s20  ;;  %s1413_s20 = scalar_lea.hbm %s2190_s13, %s1550_s15 }
 0x12b   : > { %v571_v46 = vrot.slane %v539_v43, 4  ;;  %v566_v47 = vsel %vm524_vm1, %v538_v39, %v531_v38  ;;  %s1417_s0 = sshll.u32 %s1413_s20, 4  ;;  %s1418_s0 = int_to_ptr.hbm [resolvable:$true] %s1417_s0 }
 0x12c   : > { %v562_v48 = vrot.slane %v557_v44, 4  ;;  %v565_v49 = vsel %vm524_vm1, 0, %v564_v45  ;;  %v537_v50 = vsel %vm524_vm1, 0, %v536_v42  ;;  %v585_v53 = vsel %vm524_vm1, %v564_v45, %v557_v44  ;;  %s1700_s17 = sshra.s32 %s1418_s0, 4  ;;  %s1701_s17 = int_to_ptr.hbm [resolvable:$true] %s1700_s17 }
 0x12d   : > { %v590_v51 = vrot.slane %v565_v49, 4  ;;  %v572_v52 = vsel %vm524_vm1, %v571_v46, %v537_v50  ;;  %v570_v57 = vperm.slane %v566_v47, %v1917_v14  ;;  %v589_v61 = vperm.slane %v585_v53, %v1917_v14  ;;  %s1702_s15 = scalar_lea.hbm %s1701_s17, 8  ;;  %p1707_p3 = scmp.lt.s32.totalorder %s1701_s17, %s2190_s13 }
 0x12e   : > { %v563_v54 = vsel %vm524_vm1, 0, %v562_v48  ;;  %v576_v55 = vperm.slane %v572_v52, %v1917_v14  ;;  %p1703_p0 = scmp.ne.s32.totalorder %s1701_s17, %s1702_s15 }
 0x12f   : > { %v591_v56 = vsel %vm524_vm1, %v590_v51, %v563_v54 }
 0x130   : > { %v577_v58 = vrot.slane %v576_v55, 4  ;;  %v595_v59 = vperm.slane %v591_v56, %v1917_v14  ;;  %p1704_p1 = pnand %p1703_p0, %p1876_p5 }
 0x132   : > { %v578_v60 = vsel %vm524_vm1, %v577_v58, %v570_v57  ;;  %v596_v62 = vrot.slane %v595_v59, 4  ;;  %p1705_p2 = pneg %p1704_p1 }
 0x133   : > { %v1949_v63 = vperm.slane %v578_v60, %v1922_v26 }
 0x134   : > { %v597_v0 = vsel %vm524_vm1, %v596_v62, %v589_v61 }
 0x135   : > { %v1953_v1 = vperm.slane %v597_v0, %v1922_v26  ;;  %v583_v3 = vrot.slane %v1949_v63, 4  ;;  %v607_v4 = vshrl.u32 %v1949_v63, 16 }
 0x137   : > { %v606_v5 = vpack.i.b16 %v1953_v1, %v1949_v63  ;;  %v608_v6 = vshrl.u32 %v1953_v1, 16  ;;  %v1961_v7 = vsel %vm524_vm1, 0, %v583_v3  ;;  %v602_v8 = vrot.slane %v1953_v1, 4 }
 0x138   : > { %v613_v12 = vshrl.u32 %v1961_v7, 16 }
 0x139   : > { %v1964_v9 = vpack.i.b16 %v608_v6, %v607_v4  ;;  %v1967_v10 = vsel %vm524_vm1, 0, %v602_v8 }
 0x13a   : > { %v612_v11 = vpack.i.b16 %v1967_v10, %v1961_v7  ;;  %v614_v13 = vshrl.u32 %v1967_v10, 16 }
 0x13c   : > { %v1973_v15 = vpack.i.b16 %v614_v13, %v613_v12 }
 0x174   : > { %v619_v16 = vpop.permute.xlu2 %618 }
 0x175   : > { %v628_v19 = vshrl.u32 %v619_v16, 16  ;;  %v626_v21 = vpack.i.b16 %v619_v16, %v617_v18 }
 0x177   : > { %v629_v22 = vpack.i.b16 %v628_v19, %v627_v20  ;;  %v640_v25 = vperm.slane %v626_v21, %v1917_v14 }
 0x179   : > { %v666_v29 = vperm.slane %v629_v22, %v1917_v14  ;;  %v648_v34 = vrot.slane %v640_v25, 4 }
 0x17b   : > { %v674_v39 = vrot.slane %v666_v29, 4 }
 0x17c   : > { %v621_v17 = vpop.permute.xlu2 %620 }
 0x17d   : > { %v633_v30 = vshrl.u32 %v621_v17, 16 }
 0x184   : > { %v741_v23 = vpop.permute.xlu2 %740 }
 0x185   : > { %v750_v27 = vshrl.u32 %v741_v23, 16  ;;  %v748_v35 = vpack.i.b16 %v741_v23, %v739_v24 }
 0x187   : > { %v751_v38 = vpack.i.b16 %v750_v27, %v749_v33  ;;  %v762_v45 = vperm.slane %v748_v35, %v1917_v14 }
 0x189   : > { %v788_v49 = vperm.slane %v751_v38, %v1917_v14  ;;  %v770_v62 = vrot.slane %v762_v45, 4 }
 0x18b   : > { %v623_v28 = vpop.permute.xlu0 %622  ;;  %v745_v43 = vpop.permute.xlu1 %744  ;;  %v796_v6 = vrot.slane %v788_v49, 4 }
 0x18c   : > { %v632_v31 = vpack.i.b16 %v623_v28, %v621_v17  ;;  %v634_v32 = vshrl.u32 %v623_v28, 16  ;;  %v756_v54 = vshrl.u32 %v745_v43, 16 }
 0x18e   : > { %v635_v36 = vpack.i.b16 %v634_v32, %v633_v30  ;;  %v645_v37 = vperm.slane %v632_v31, %v1917_v14 }
 0x190   : > { %v646_v40 = vrot.slane %v645_v37, 4  ;;  %v649_v41 = vsel %vm524_vm1, %v645_v37, %v648_v34  ;;  %v671_v42 = vperm.slane %v635_v36, %v1917_v14 }
 0x191   : > { %v657_v44 = vperm.slane %v649_v41, %v1922_v26 }
 0x192   : > { %v647_v46 = vsel %vm524_vm1, %v646_v40, %v640_v25  ;;  %v672_v47 = vrot.slane %v671_v42, 4  ;;  %v675_v48 = vsel %vm524_vm1, %v671_v42, %v674_v39 }
 0x193   : > { %v653_v50 = vperm.slane %v647_v46, %v1922_v26  ;;  %v660_v51 = vrot.slane %v657_v44, 4  ;;  %v683_v52 = vperm.slane %v675_v48, %v1922_v26  ;;  %v743_v53 = vpop.permute.xlu0 %742 }
 0x194   : > { %v673_v55 = vsel %vm524_vm1, %v672_v47, %v666_v29  ;;  %v754_v56 = vpack.i.b16 %v745_v43, %v743_v53  ;;  %v755_v57 = vshrl.u32 %v743_v53, 16 }
 0x195   : > { %v658_v58 = vrot.slane %v653_v50, 4  ;;  %v661_v59 = vsel %vm524_vm1, 0, %v660_v51  ;;  %v679_v60 = vperm.slane %v673_v55, %v1922_v26  ;;  %v686_v61 = vrot.slane %v683_v52, 4 }
 0x196   : > { %v693_v0 = vrot.slane %v661_v59, 4  ;;  %v757_v3 = vpack.i.b16 %v756_v54, %v755_v57  ;;  %v767_v4 = vperm.slane %v754_v56, %v1917_v14  ;;  %v688_v22 = vsel %vm524_vm1, %v660_v51, %v653_v50 }
 0x197   : > { %v659_v8 = vsel %vm524_vm1, 0, %v658_v58  ;;  %v684_v12 = vrot.slane %v679_v60, 4  ;;  %v687_v13 = vsel %vm524_vm1, 0, %v686_v61  ;;  %v707_v32 = vsel %vm524_vm1, %v686_v61, %v679_v60 }
 0x198   : > { %v712_v16 = vrot.slane %v687_v13, 4  ;;  %v768_v17 = vrot.slane %v767_v4, 4  ;;  %v771_v18 = vsel %vm524_vm1, %v767_v4, %v770_v62  ;;  %v793_v19 = vperm.slane %v757_v3, %v1917_v14 }
 0x199   : > { %v779_v20 = vperm.slane %v771_v18, %v1922_v26  ;;  %v685_v21 = vsel %vm524_vm1, 0, %v684_v12  ;;  %v694_v23 = vsel %vm524_vm1, %v693_v0, %v659_v8  ;;  %v692_v34 = vperm.slane %v688_v22, %v1917_v14 }
 0x19a   : > { %v769_v24 = vsel %vm524_vm1, %v768_v17, %v762_v45  ;;  %v794_v25 = vrot.slane %v793_v19, 4  ;;  %v797_v27 = vsel %vm524_vm1, %v793_v19, %v796_v6  ;;  %v698_v28 = vperm.slane %v694_v23, %v1917_v14 }
 0x19b   : > { %v775_v29 = vperm.slane %v769_v24, %v1922_v26  ;;  %v782_v30 = vrot.slane %v779_v20, 4  ;;  %v805_v31 = vperm.slane %v797_v27, %v1922_v26  ;;  %v713_v36 = vsel %vm524_vm1, %v712_v16, %v685_v21 }
 0x19c   : > { %v795_v33 = vsel %vm524_vm1, %v794_v25, %v788_v49  ;;  %v699_v35 = vrot.slane %v698_v28, 4  ;;  %v711_v43 = vperm.slane %v707_v32, %v1917_v14  ;;  %v717_v44 = vperm.slane %v713_v36, %v1917_v14 }
 0x19d   : > { %v780_v37 = vrot.slane %v775_v29, 4  ;;  %v783_v38 = vsel %vm524_vm1, 0, %v782_v30  ;;  %v801_v39 = vperm.slane %v795_v33, %v1922_v26  ;;  %v808_v40 = vrot.slane %v805_v31, 4 }
 0x19e   : > { %v815_v41 = vrot.slane %v783_v38, 4  ;;  %v700_v42 = vsel %vm524_vm1, %v699_v35, %v692_v34  ;;  %v718_v50 = vrot.slane %v717_v44, 4  ;;  %v810_v51 = vsel %vm524_vm1, %v782_v30, %v775_v29 }
 0x19f   : > { %v781_v45 = vsel %vm524_vm1, 0, %v780_v37  ;;  %v806_v46 = vrot.slane %v801_v39, 4  ;;  %v809_v47 = vsel %vm524_vm1, 0, %v808_v40  ;;  %v704_v48 = vperm.slane %v700_v42, %v1922_v26 }
 0x1a0   : > { %v834_v49 = vrot.slane %v809_v47, 4  ;;  %v816_v52 = vsel %vm524_vm1, %v815_v41, %v781_v45  ;;  %v719_v56 = vsel %vm524_vm1, %v718_v50, %v711_v43  ;;  %v814_v59 = vperm.slane %v810_v51, %v1917_v14 }
 0x1a1   : > { %v705_v53 = vrot.slane %v704_v48, 4  ;;  %v807_v54 = vsel %vm524_vm1, 0, %v806_v46  ;;  %v820_v55 = vperm.slane %v816_v52, %v1917_v14  ;;  %v723_v58 = vperm.slane %v719_v56, %v1922_v26 }
 0x1a2   : > { %v835_v57 = vsel %vm524_vm1, %v834_v49, %v807_v54  ;;  %v829_v61 = vsel %vm524_vm1, %v808_v40, %v801_v39  ;;  %v729_v62 = vshrl.u32 %v704_v48, 16 }
 0x1a3   : > { %v821_v60 = vrot.slane %v820_v55, 4  ;;  %v706_v0 = vsel %vm524_vm1, 0, %v705_v53  ;;  %v839_v3 = vperm.slane %v835_v57, %v1917_v14  ;;  %v728_v4 = vpack.i.b16 %v723_v58, %v704_v48 }
 0x1a4   : > { %v730_v6 = vshrl.u32 %v723_v58, 16  ;;  %v724_v8 = vrot.slane %v723_v58, 4  ;;  %v833_v16 = vperm.slane %v829_v61, %v1917_v14  ;;  %v735_v22 = vshrl.u32 %v706_v0, 16 }
 0x1a5   : > { %v822_v12 = vsel %vm524_vm1, %v821_v60, %v814_v59  ;;  %v840_v17 = vrot.slane %v839_v3, 4  ;;  %v865_v18 = vsel %vm860_vm2, %v728_v4, 0 }
 0x1a6   : > { %v826_v13 = vperm.slane %v822_v12, %v1922_v26  ;;  %v731_v19 = vpack.i.b16 %v730_v6, %v729_v62  ;;  %v725_v20 = vsel %vm524_vm1, 0, %v724_v8  ;;  %874 = vmatpush.bf16.xpose.msra.mxu1 %v865_v18 }
 0x1a7   : > { %v734_v21 = vpack.i.b16 %v725_v20, %v706_v0  ;;  %v736_v23 = vshrl.u32 %v725_v20, 16  ;;  %v841_v24 = vsel %vm524_vm1, %v840_v17, %v833_v16 }
 0x1a8   : > { %v884_v25 = vsel %vm860_vm2, %v731_v19, 0  ;;  %v845_v27 = vperm.slane %v841_v24, %v1922_v26  ;;  %v827_v28 = vrot.slane %v826_v13, 4  ;;  %v851_v31 = vshrl.u32 %v826_v13, 16 }
 0x1a9   : > { %893 = vmatpush.bf16.xpose.msra.mxu2 %v884_v25  ;;  %v903_v29 = vsel %vm860_vm2, %v734_v21, 0  ;;  %v737_v30 = vpack.i.b16 %v736_v23, %v735_v22 }
 0x1aa   : > { %912 = vmatpush.bf16.xpose.msra.mxu3 %v903_v29  ;;  %v850_v32 = vpack.i.b16 %v845_v27, %v826_v13  ;;  %v852_v33 = vshrl.u32 %v845_v27, 16  ;;  %v828_v34 = vsel %vm524_vm1, 0, %v827_v28  ;;  %v846_v35 = vrot.slane %v845_v27, 4 }
 0x1ab   : > { %v922_v36 = vsel %vm860_vm2, %v737_v30, 0  ;;  %v857_v41 = vshrl.u32 %v828_v34, 16 }
 0x1ac   : > { %931 = vmatpush.bf16.xpose.msrb.mxu0 %v922_v36  ;;  %v982_v37 = vsel %vm980_vm3, %v850_v32, 0  ;;  %v853_v38 = vpack.i.b16 %v852_v33, %v851_v31  ;;  %v847_v39 = vsel %vm524_vm1, 0, %v846_v35 }
 0x1ad   : > { %v856_v40 = vpack.i.b16 %v847_v39, %v828_v34  ;;  %v858_v42 = vshrl.u32 %v847_v39, 16  ;;  %1506 = vmatmul.msk.bf16.vlgmr.msra.gmra.mxu1 %vm860_vm2, %v606_v5 }
 0x1ae   : > { %991 = vmatpush.bf16.msrb.mxu1 %v982_v37  ;;  %v1001_v43 = vsel %vm980_vm3, %v853_v38, 0 }
 0x1af   : > { %v1020_v44 = vsel %vm980_vm3, %v856_v40, 0  ;;  %v859_v45 = vpack.i.b16 %v858_v42, %v857_v41 }
 0x1b0   : > { %1507 = vmatmul.msk.bf16.vlgmr.msra.gmra.mxu2 %vm860_vm2, %v1964_v9 }
 0x1b1   : > { %1010 = vmatpush.bf16.msrb.mxu2 %v1001_v43  ;;  %1508 = vmatmul.msk.bf16.vlgmr.msra.gmra.mxu3 %vm860_vm2, %v612_v11  ;;  %v1039_v46 = vsel %vm980_vm3, %v859_v45, 0 }
 0x1b2   : > { %1029 = vmatpush.bf16.msrb.mxu3 %v1020_v44 }
 0x1b3   : > { %1509 = vmatmul.msk.bf16.vlgmr.msrb.gmra.mxu0 %vm860_vm2, %v1973_v15 }
 0x1b4   : > { %1048 = vmatpush.bf16.msra.mxu0 %v1039_v46 }
 0x22a   : > { %v876_v63 = vpop.f32.mrf.mxu1 }
 0x22b   : > { %v937_v1 = vsel %vm860_vm2, %v876_v63, -inf }
 0x22c   : > { %938 = vmax.xlane.f32.xlu1 %v937_v1 }
 0x230   : > { %v933_v5 = vpop.f32.mrf.mxu0 }
 0x231   : > { %v946_v51 = vsel %vm860_vm2, %v933_v5, -inf }
 0x232   : > { %v878_v47 = vpop.f32.mrf.mxu1 }
 0x233   : > { %v895_v48 = vpop.f32.mrf.mxu2 }
 0x234   : > { %v914_v9 = vpop.f32.mrf.mxu3  ;;  %v940_v49 = vsel %vm860_vm2, %v895_v48, -inf }
 0x235   : > { %941 = vmax.xlane.f32.xlu2 %v940_v49  ;;  %v943_v7 = vsel %vm860_vm2, %v914_v9, -inf }
 0x236   : > { %944 = vmax.xlane.f32.xlu0 %v943_v7 }
 0x238   : > { %v935_v10 = vpop.f32.mrf.mxu0 }
 0x23b   : > { %v897_v11 = vpop.f32.mrf.mxu2 }
 0x23c   : > { %v916_v50 = vpop.f32.mrf.mxu3 }
 0x23d   : > { %947 = vmax.xlane.f32.xlu2 %v946_v51 }
 0x29f   : > { %v939_v15 = vpop.xlane.xlu1 %938 }
 0x2a0   : > { %v949_v52 = vsub.f32 %v876_v63, %v939_v15 }
 0x2a2   : > { %v953_v53 = vmul.f32 1.442695, %v949_v52 }
 0x2a4   : > { %1634 = vpow2.f32 %v953_v53 }
 0x2a8   : > { %v942_v54 = vpop.xlane.xlu2 %941 }
 0x2a9   : > { %v950_v55 = vsub.f32 %v895_v48, %v942_v54  ;;  %v945_v56 = vpop.xlane.xlu0 %944 }
 0x2aa   : > { %v951_v57 = vsub.f32 %v914_v9, %v945_v56  ;;  %v1635_v58 = vpop.eup %1634 }
 0x2ab   : > { %v955_v59 = vmul.f32 1.442695, %v950_v55  ;;  %v961_v61 = vsel %vm860_vm2, %v1635_v58, 0.0  ;;  %v973_v62 = vpack.c.bf16 %v1635_v58, %v1635_v58 }
 0x2ac   : > { %v957_v60 = vmul.f32 1.442695, %v951_v57  ;;  %962 = vadd.xlane.f32.xlu2 %v961_v61 }
 0x2ad   : > { %1636 = vpow2.f32 %v955_v59  ;;  %1510 = vmatmul.msk.bf16.vlgmr.msrb.gmra.mxu1 %vm860_vm2, %v973_v62 }
 0x2ae   : > { %1638 = vpow2.f32 %v957_v60 }
 0x2b0   : > { %v948_v0 = vpop.xlane.xlu2 %947 }
 0x2b1   : > { %v952_v3 = vsub.f32 %v933_v5, %v948_v0 }
 0x2b3   : > { %v1637_v4 = vpop.eup %1636  ;;  %v959_v6 = vmul.f32 1.442695, %v952_v3 }
 0x2b4   : > { %v1639_v8 = vpop.eup %1638  ;;  %v964_v12 = vsel %vm860_vm2, %v1637_v4, 0.0  ;;  %v974_v13 = vpack.c.bf16 %v1637_v4, %v1637_v4 }
 0x2b5   : > { %1640 = vpow2.f32 %v959_v6  ;;  %965 = vadd.xlane.f32.xlu0 %v964_v12  ;;  %v967_v16 = vsel %vm860_vm2, %v1639_v8, 0.0  ;;  %v975_v17 = vpack.c.bf16 %v1639_v8, %v1639_v8 }
 0x2b6   : > { %1511 = vmatmul.msk.bf16.vlgmr.msrb.gmra.mxu2 %vm860_vm2, %v974_v13  ;;  %968 = vadd.xlane.f32.xlu1 %v967_v16 }
 0x2b7   : > { %1512 = vmatmul.msk.bf16.vlgmr.msrb.gmra.mxu3 %vm860_vm2, %v975_v17 }
 0x2bb   : > { %v1641_v18 = vpop.eup %1640 }
 0x2bc   : > { %v976_v19 = vpack.c.bf16 %v1641_v18, %v1641_v18  ;;  %v970_v20 = vsel %vm860_vm2, %v1641_v18, 0.0 }
 0x2bd   : > { %971 = vadd.xlane.f32.xlu2 %v970_v20 }
 0x2be   : > { %1513 = vmatmul.msk.bf16.vlgmr.msra.gmra.mxu0 %vm860_vm2, %v976_v19 }
 0x31f   : > { %v963_v21 = vpop.xlane.xlu2 %962 }
 0x320   : > { %1642 = vrcp.f32 %v963_v21 }
 0x326   : > { %v1643_v28 = vpop.eup %1642 }
 0x328   : > { %v966_v23 = vpop.xlane.xlu0 %965 }
 0x329   : > { %v969_v24 = vpop.xlane.xlu1 %968  ;;  %1644 = vrcp.f32 %v966_v23 }
 0x32a   : > { %v993_v22 = vpop.f32.mrf.mxu1  ;;  %1646 = vrcp.f32 %v969_v24 }
 0x32b   : > { %v1058_v29 = vmul.f32 %v1643_v28, %v993_v22 }
 0x32d   : > { %v1062_v33 = vpack.c.bf16 %v1058_v29, %v1058_v29 }
 0x32f   : > { %v1645_v30 = vpop.eup %1644  ;;  %v1069_v42 = vshrl.u32 %v1062_v33, 16 }
 0x330   : > { %v972_v25 = vpop.xlane.xlu2 %971  ;;  %v1647_v32 = vpop.eup %1646 }
 0x331   : > { %1648 = vrcp.f32 %v972_v25 }
 0x332   : > { %v995_v27 = vpop.f32.mrf.mxu1 }
 0x337   : > { %v1649_v36 = vpop.eup %1648 }
 0x339   : > { %v1012_v31 = vpop.f32.mrf.mxu2 }
 0x33a   : > { %v1059_v34 = vmul.f32 %v1645_v30, %v1012_v31  ;;  %v1031_v35 = vpop.f32.mrf.mxu3 }
 0x33b   : > { %v1060_v37 = vmul.f32 %v1647_v32, %v1031_v35  ;;  %v1050_v38 = vpop.f32.mrf.mxu0 }
 0x33c   : > { %v1063_v39 = vpack.c.bf16 %v1059_v34, %v1059_v34  ;;  %v1061_v40 = vmul.f32 %v1649_v36, %v1050_v38 }
 0x33d   : > { %v1064_v41 = vpack.c.bf16 %v1060_v37, %v1060_v37 }
 0x33e   : > { %v1068_v43 = vpack.i.b16 %v1063_v39, %v1062_v33  ;;  %v1070_v44 = vshrl.u32 %v1063_v39, 16  ;;  %v1065_v45 = vpack.c.bf16 %v1061_v40, %v1061_v40 }
 0x33f   : > { %v1075_v46 = vshrl.u32 %v1064_v41, 16 }
 0x340   : > { %v1071_v63 = vpack.i.b16 %v1070_v44, %v1069_v42  ;;  %v1082_v1 = vperm.slane %v1068_v43, %v1917_v14  ;;  %v1074_v5 = vpack.i.b16 %v1065_v45, %v1064_v41  ;;  %v1076_v47 = vshrl.u32 %v1065_v45, 16 }
 0x341   : > { %v1014_v48 = vpop.f32.mrf.mxu2 }
 0x342   : > { %v1090_v9 = vrot.slane %v1082_v1, 4  ;;  %v1108_v49 = vperm.slane %v1071_v63, %v1917_v14  ;;  %v1077_v7 = vpack.i.b16 %v1076_v47, %v1075_v46  ;;  %v1087_v10 = vperm.slane %v1074_v5, %v1917_v14  ;;  %v1033_v11 = vpop.f32.mrf.mxu3  ;;  %v1556_v5 = vld [vmem:[%s2180_s3 + $0x8] sm:$0xff]  ;;  %v1555_v47 = vld [vmem:[%s2180_s3] sm:$0xff] }
 0x343   : > { %v1052_v50 = vpop.f32.mrf.mxu0  ;;  %1229 = vmatpush.bf16.msra.mxu1 %v1556_v5 }
 0x344   : > { %v1116_v51 = vrot.slane %v1108_v49, 4  ;;  %v1088_v15 = vrot.slane %v1087_v10, 4  ;;  %v1091_v52 = vsel %vm524_vm1, %v1087_v10, %v1090_v9  ;;  %v1113_v53 = vperm.slane %v1077_v7, %v1917_v14  ;;  %v1627_v50 = vld [vmem:[%s2181_s4] ss:$0 sm:$0xff] }
 0x345   : > { %v1099_v54 = vperm.slane %v1091_v52, %v1922_v26 }
 0x346   : > { %v1089_v55 = vsel %vm524_vm1, %v1088_v15, %v1082_v1  ;;  %v1114_v56 = vrot.slane %v1113_v53, 4  ;;  %v1117_v57 = vsel %vm524_vm1, %v1113_v53, %v1116_v51 }
 0x347   : > { %v1095_v58 = vperm.slane %v1089_v55, %v1922_v26  ;;  %v1102_v59 = vrot.slane %v1099_v54, 4  ;;  %v1125_v60 = vperm.slane %v1117_v57, %v1922_v26  ;;  %1230 = vmatpush.bf16.msra.mxu1 %v1555_v47  ;;  %v1767_v55 = vmov 32.0  }
 0x348   : > { %v1115_v61 = vsel %vm524_vm1, %v1114_v56, %v1108_v49  ;;  %1650 = vrcp.f32 %v1767_v55 }
 0x349   : > { %v1100_v62 = vrot.slane %v1095_v58, 4  ;;  %v1103_v0 = vsel %vm524_vm1, 0, %v1102_v59  ;;  %v1121_v3 = vperm.slane %v1115_v61, %v1922_v26  ;;  %v1128_v4 = vrot.slane %v1125_v60, 4 }
 0x34a   : > { %v1135_v6 = vrot.slane %v1103_v0, 4  ;;  %v1130_v16 = vsel %vm524_vm1, %v1102_v59, %v1095_v58 }
 0x34b   : > { %v1101_v8 = vsel %vm524_vm1, 0, %v1100_v62  ;;  %v1126_v12 = vrot.slane %v1121_v3, 4  ;;  %v1129_v13 = vsel %vm524_vm1, 0, %v1128_v4  ;;  %v1149_v21 = vsel %vm524_vm1, %v1128_v4, %v1121_v3 }
 0x34c   : > { %v1136_v17 = vsel %vm524_vm1, %v1135_v6, %v1101_v8  ;;  %v1154_v18 = vrot.slane %v1129_v13, 4  ;;  %v1134_v23 = vperm.slane %v1130_v16, %v1917_v14  ;;  %v1153_v28 = vperm.slane %v1149_v21, %v1917_v14  ;;  %v1557_v8 = vld [vmem:[#allocation2] sm:$0xff] }
 0x34d   : > { %v1127_v19 = vsel %vm524_vm1, 0, %v1126_v12  ;;  %v1140_v20 = vperm.slane %v1136_v17, %v1917_v14  ;;  %v1562_v12 = vld [vmem:[%s2186_s9 + $0x18] sm:$0xff]  ;;  %v1561_v17 = vld [vmem:[%s2186_s9 + $0x10] sm:$0xff] }
 0x34e   : > { %v1155_v22 = vsel %vm524_vm1, %v1154_v18, %v1127_v19  ;;  %v1651_v56 = vpop.eup %1650  ;;  %1359 = vmatpush.bf16.msra.mxu3 %v1562_v12  ;;  %v1560_v19 = vld [vmem:[%s2186_s9 + $0x8] sm:$0xff] }
 0x34f   : > { %v1141_v24 = vrot.slane %v1140_v20, 4  ;;  %v1159_v25 = vperm.slane %v1155_v22, %v1917_v14  ;;  %v1243_v57 = vmul.f32 32.0, %v1651_v56  ;;  %vm1247_vm6 = vweird.f32 %v1651_v56 }
 0x351   : > { %v1142_v27 = vsel %vm524_vm1, %v1141_v24, %v1134_v23  ;;  %v1160_v29 = vrot.slane %v1159_v25, 4  ;;  %v1244_v58 = vsub.f32 1.0, %v1243_v57 }
 0x352   : > { %v1146_v30 = vperm.slane %v1142_v27, %v1922_v26  ;;  %1360 = vmatpush.bf16.msra.mxu3 %v1561_v17  ;;  %v1628_v27 = vld [vmem:[%s2182_s5] ss:$0 sm:$0xff] }
 0x353   : > { %v1161_v31 = vsel %vm524_vm1, %v1160_v29, %v1153_v28  ;;  %v1245_v59 = vmul.f32 %v1651_v56, %v1244_v58  ;;  %v1629_v29 = vld [vmem:[%s2183_s6] ss:$0 sm:$0xff] }
 0x354   : > { %v1165_v32 = vperm.slane %v1161_v31, %v1922_v26  ;;  %v1147_v33 = vrot.slane %v1146_v30, 4  ;;  %v1171_v34 = vshrl.u32 %v1146_v30, 16 }
 0x355   : > { %v1246_v60 = vadd.f32 %v1651_v56, %v1245_v59 }
 0x356   : > { %v1172_v35 = vshrl.u32 %v1165_v32, 16  ;;  %v1148_v36 = vsel %vm524_vm1, 0, %v1147_v33  ;;  %v1166_v37 = vrot.slane %v1165_v32, 4  ;;  %v1170_v38 = vpack.i.b16 %v1165_v32, %v1146_v30  ;;  %1361 = vmatpush.bf16.msra.mxu3 %v1560_v19 }
 0x357   : > { %v1177_v42 = vshrl.u32 %v1148_v36, 16  ;;  %v1248_v61 = vsel %vm1247_vm6, %v1651_v56, %v1246_v60 }
 0x358   : > { %v1173_v39 = vpack.i.b16 %v1172_v35, %v1171_v34  ;;  %v1167_v40 = vsel %vm524_vm1, 0, %v1166_v37  ;;  %v1559_v34 = vld [vmem:[%s2186_s9] sm:$0xff] }
 0x359   : > { %v1176_v41 = vpack.i.b16 %v1167_v40, %v1148_v36  ;;  %v1178_v14 = vshrl.u32 %v1167_v40, 16  ;;  %v1630_v35 = vld [vmem:[%s2185_s8] ss:$0 sm:$0xff] }
 0x35a   : > { %v1180_v43 = vunpack.c.l.b16 %v1173_v39  ;;  %1362 = vmatpush.bf16.msra.mxu3 %v1559_v34 }
 0x35b   : > { %v1184_v44 = vunpack.c.l.b16 %v1176_v41  ;;  %v1179_v45 = vpack.i.b16 %v1178_v14, %v1177_v42  ;;  %v1631_v41 = vld [vmem:[%s2187_s10] ss:$0 sm:$0xff] }
 0x35c   : > { %v1181_v46 = vpack.c.b16 %v1180_v43, %v1180_v43 }
 0x35d   : > { %v1185_v63 = vpack.c.b16 %v1184_v44, %v1184_v44  ;;  %v1188_v1 = vunpack.c.l.b16 %v1179_v45 }
 0x35e   : > { %1182 = vrot.lane.b32.xlu0 %v1181_v46, %s1764_s21 }
 0x35f   : > { %1186 = vrot.lane.b32.xlu1 %v1185_v63, %s1765_s23  ;;  %v1189_v26 = vpack.c.b16 %v1188_v1, %v1188_v1 }
 0x361   : > { %1190 = vrot.lane.b32.xlu2 %v1189_v26, %s1766_s22  ;;  %s448_s22 = scalar_lea.vmem [#allocation5], %s1495_s30  ;;  %s1706_s30 = scalar_lea.hbm %s2190_s13, 16 }
 0x362   : > { %s1415_s29 = sshll.u32 %s448_s22, 4  ;;  %p1708_p4 = scmp.lt.s32.totalorder %s1706_s30, %s1702_s15  ;;  %s1416_s29 = int_to_ptr.vmem [resolvable:$true] %s1415_s29 }
 0x364   : > { %p1709_p7 = por %p1708_p4, %p1707_p3 }
 0x366   : > { %p1710_p8 = pnand %p1709_p7, %p1705_p2 }
 0x3bb   : > { %v1191_v7 = vpop.permute.xlu2 %1190 }
 0x3d0   : > { %v1183_v48 = vpop.permute.xlu0 %1182 }
 0x3d1   : > { %v1194_v9 = vsel %vm860_vm2, %v1170_v38, %v1183_v48  ;;  %v1187_v49 = vpop.permute.xlu1 %1186 }
 0x3d2   : > { %v1197_v10 = vsel %vm1195_vm4, %v1194_v9, %v1187_v49 }
 0x3d3   : > { %v1200_v11 = vsel %vm1198_vm5, %v1197_v10, %v1191_v7 }
 0x3d4   : > { %1522 = vmatmul.msk.bf16.vlgmr.msra.gmra.mxu1 %vm476_vm0, %v1200_v11 }
 0x451   : > { %v1232_v51 = vpop.f32.mrf.mxu1 }
 0x452   : > { %v1233_v15 = vadd.f32 %v1627_v50, %v1232_v51 }
 0x454   : > { %v1236_v52 = vadd.f32 %v1233_v15, %v1907_v2  ;;  %v1558_v2 = vld [vmem:[#allocation2 + $0x8] sm:$0xff]  ;;  %v1632_v15 = vld [vmem:[%s2188_s11] ss:$0 sm:$0xff] }
 0x455   : > { %1306 = vmatpush.bf16.msra.mxu2 %v1558_v2 }
 0x456   : > { %v1239_v53 = vsel %vm476_vm0, %v1236_v52, 0.0 }
 0x457   : > { %1240 = vadd.xlane.f32.xlu0 %v1239_v53 }
 0x459   : > { %v1234_v54 = vpop.f32.mrf.mxu1  ;;  %1307 = vmatpush.bf16.msra.mxu2 %v1557_v8 }
 0x45a   : > { %v1633_v54 = vld [vmem:[%s2189_s12] ss:$0 sm:$0xff] }
 0x4ca   : > { %v1241_v62 = vpop.xlane.xlu0 %1240 }
 0x4cb   : > { %v1249_v0 = vmul.f32 %v1248_v61, %v1241_v62 }
 0x4cd   : > { %v1250_v3 = vsub.f32 %v1236_v52, %v1249_v0 }
 0x4cf   : > { %v1251_v4 = vmul.f32 %v1250_v3, %v1250_v3 }
 0x4d1   : > { %v1252_v6 = vsel %vm476_vm0, %v1251_v4, 0.0 }
 0x4d2   : > { %1253 = vadd.xlane.f32.xlu1 %v1252_v6 }
 0x545   : > { %v1254_v13 = vpop.xlane.xlu1 %1253 }
 0x546   : > { %v1255_v16 = vmul.f32 %v1254_v13, %v1248_v61 }
 0x548   : > { %v1256_v18 = vadd.f32 1e-05, %v1255_v16 }
 0x54a   : > { %1652 = vrsqrt.f32 %v1256_v18  ;;  %vm1263_vm8 = vweird.f32 %v1256_v18 }
 0x550   : > { %v1653_v20 = vpop.eup %1652 }
 0x551   : > { %v1258_v21 = vmul.f32 %v1653_v20, %v1256_v18  ;;  %vm1264_vm7 = vweird.f32 %v1653_v20 }
 0x552   : > { %vm1265_vm9 = vmor %vm1263_vm8, %vm1264_vm7 }
 0x553   : > { %v1259_v22 = vmul.f32 %v1653_v20, %v1258_v21 }
 0x555   : > { %v1260_v23 = vmul.f32 0.5, %v1259_v22 }
 0x557   : > { %v1261_v24 = vsub.f32 1.5, %v1260_v23 }
 0x559   : > { %v1262_v25 = vmul.f32 %v1653_v20, %v1261_v24 }
 0x55b   : > { %v1266_v28 = vsel %vm1265_vm9, %v1653_v20, %v1262_v25 }
 0x55c   : > { %v1267_v30 = vmul.f32 %v1266_v28, %v1250_v3 }
 0x55e   : > { %v1271_v31 = vmul.f32 %v1628_v27, %v1267_v30 }
 0x560   : > { %v1275_v32 = vadd.f32 %v1629_v29, %v1271_v31 }
 0x562   : > { %v1276_v33 = vpack.c.bf16 %v1275_v32, %v1275_v32 }
 0x564   : > { %1531 = vmatmul.msk.bf16.vlgmr.msra.gmra.mxu2 %vm476_vm0, %v1276_v33 }
 0x5e7   : > { %v1309_v36 = vpop.f32.mrf.mxu2 }
 0x5e8   : > { %v1310_v37 = vadd.f32 %v1630_v35, %v1309_v36 }
 0x5ea   : > { %v1313_v38 = vmax.f32 %v1310_v37, 0.0 }
 0x5ec   : > { %v1314_v39 = vpack.c.bf16 %v1313_v38, %v1313_v38 }
 0x5ee   : > { %1548 = vmatmul.msk.bf16.vlgmr.msra.gmra.mxu3 %vm1351_vm10, %v1314_v39 }
 0x5ef   : > { %v1311_v40 = vpop.f32.mrf.mxu2 }
 0x671   : > { %v1364_v42 = vpop.f32.mrf.mxu3 }
 0x672   : > { %v1365_v14 = vadd.f32 %v1631_v41, %v1364_v42 }
 0x674   : > { %v1368_v43 = vadd.f32 %v1365_v14, %v1275_v32 }
 0x676   : > { %v1371_v44 = vsel %vm476_vm0, %v1368_v43, 0.0 }
 0x677   : > { %1372 = vadd.xlane.f32.xlu2 %v1371_v44 }
 0x679   : > { %v1366_v45 = vpop.f32.mrf.mxu3 }
 0x6ea   : > { %v1373_v46 = vpop.xlane.xlu2 %1372 }
 0x6eb   : > { %v1374_v63 = vmul.f32 %v1373_v46, %v1248_v61 }
 0x6ed   : > { %v1375_v1 = vsub.f32 %v1368_v43, %v1374_v63 }
 0x6ef   : > { %v1376_v26 = vmul.f32 %v1375_v1, %v1375_v1 }
 0x6f1   : > { %v1377_v5 = vsel %vm476_vm0, %v1376_v26, 0.0 }
 0x6f2   : > { %1378 = vadd.xlane.f32.xlu0 %v1377_v5 }
 0x765   : > { %v1379_v47 = vpop.xlane.xlu0 %1378 }
 0x766   : > { %v1380_v48 = vmul.f32 %v1379_v47, %v1248_v61 }
 0x768   : > { %v1381_v9 = vadd.f32 1e-05, %v1380_v48 }
 0x76a   : > { %1654 = vrsqrt.f32 %v1381_v9  ;;  %vm1388_vm12 = vweird.f32 %v1381_v9 }
 0x770   : > { %v1655_v49 = vpop.eup %1654 }
 0x771   : > { %v1383_v7 = vmul.f32 %v1655_v49, %v1381_v9  ;;  %vm1389_vm11 = vweird.f32 %v1655_v49 }
 0x772   : > { %vm1390_vm13 = vmor %vm1388_vm12, %vm1389_vm11 }
 0x773   : > { %v1384_v10 = vmul.f32 %v1655_v49, %v1383_v7 }
 0x775   : > { %v1385_v11 = vmul.f32 0.5, %v1384_v10 }
 0x777   : > { %v1386_v50 = vsub.f32 1.5, %v1385_v11 }
 0x779   : > { %v1387_v51 = vmul.f32 %v1655_v49, %v1386_v50 }
 0x77b   : > { %v1391_v52 = vsel %vm1390_vm13, %v1655_v49, %v1387_v51 }
 0x77c   : > { %v1392_v53 = vmul.f32 %v1391_v52, %v1375_v1 }
 0x77e   : > { %v1396_v55 = vmul.f32 %v1632_v15, %v1392_v53 }
 0x780   : > { %v1400_v56 = vadd.f32 %v1633_v54, %v1396_v55 }
 0x782   : > { %1401 = vst.msk [vmem:[%s448_s22] sm:$0xff] %vm476_vm0, %v1400_v56 }
 0x783   : > { %1713 = shalt.err (!%p1710_p8)
}
 0x784   : > { %1567 = dma.vmem_to_hbm [thread:$0]  (%p1876_p5), %s1416_s29, 128, %s1418_s0, %s1403_s27  }
 0x785 PF: > { %p1579_p9 = scmp.ge.s32.totalorder %s1752_s28, 2  ;;  %s1429_s24 = sand.u32 1, %s1740_s25  }
 0x786   : > { %s1430_s23 = scalar_lea.sflag [#allocation4], %s1429_s24 }
 0x787   : > { %p1574_p10 = pnand %p1579_p9, %p1880_p6 }
 0x789   : > { %p1575_p11 = pneg %p1574_p10 }
 0x78b   : > { %1735 = dma.done.wait (%p1575_p11), %s1430_s23, 128  }
 0x78c   : > { %1737 = vsyncadd (%p1575_p11), %s1430_s23, 4294967168  ;;  %s2200_s22 = sld [smem:[#allocation8_spill]]  ;;  %p24_p12 = scmp.ge.s32.totalorder %s1863_s14, 4  }
 0x78d   : > { %s2201_s27 = sld [smem:[#allocation9_spill]]  ;;  %s2202_s25 = smov %s1744_s26 }
 0x78e   : > { %s2204_s28 = smov %s1863_s14  ;;  %26 = sbr.rel (!%p24_p12) target bundleno = 7 (0x7), region = 112 }
 0x792   : > { %s2203_s26 = smov %s2200_s22 }
 0x793   :  { %1436 = vsyncpa [#allocation3], 1 }
 0x794   :  { %1438 = vsyncpa [#allocation3 + $0x1], 1 }
 0x795   :  { %1439 = vsyncpa [#allocation4], 1 }
 0x796   :  { %1441 = vsyncpa [#allocation4 + $0x1], 1 }

</bundles_post_ra>
